<compile_context>
chip_gen: v7x
topology: tpu7x:2x2x1
jax: 0.10.0
libtpu: 0.0.40
codegen_flags: <defaults>
</compile_context>

<pallas_src>
import math

import jax
import jax.numpy as jnp
from jax.experimental import pallas as pl
from jax.experimental.pallas import tpu as pltpu

EPS_RMS = 1e-6        # RMSNorm eps (module default)
EPS_Q = 1e-5          # clamp floor of the BitNet quantizers
DEQUANT_EPS = 1e-9    # dequant-factor guard from BitMatmulFunction.forward

RMS_BLOCK_BYTES = 8 * 1024 * 1024   # f32 bytes per RMSNorm/quant input block


def _round_up(x, m):
    return ((x + m - 1) // m) * m


def _device_kind():
    try:
        return jax.devices()[0].device_kind.lower()
    except Exception:
        return ""


def _is_v7():
    return "7" in _device_kind()


def _mxu_supports_int8():
    # int8 MXU path only on chips where it is known-good (review targets v5e/v6e);
    # v7x (no integer MXU) and unknown chips fall back to the bf16 path.
    k = _device_kind()
    return ("v5" in k) or ("v6" in k)


def _vmem_limit_bytes():
    cap = None
    try:
        info = pltpu.get_tpu_info()
        cap = int(getattr(info, "vmem_capacity_bytes", 0)) or None
    except Exception:
        cap = None
    if cap is None:
        cap = (64 << 20) if _is_v7() else (128 << 20)
    return int(min(cap * 3 // 4, 100 << 20))


def _choose_tile(dim, cap, granule, alpha=0.03):
    """Pick (tile, padded_dim): tile multiple of `granule`, <= cap, dividing
    padded_dim, trading padding waste against tile size."""
    dim_g = _round_up(dim, granule)
    if dim_g <= cap:
        return dim_g, dim_g          # single block, minimal padding
    best = None
    t = (cap // granule) * granule
    while t >= granule:
        pad = _round_up(dim, t)
        score = pad / dim + alpha * (cap / t)
        if best is None or score < best[0]:
            best = (score, t, pad)
        t -= granule
    return best[1], best[2]


def _pick_rows(m_pad, k_pad, max_bytes=RMS_BLOCK_BYTES):
    """Largest multiple-of-32 row tile dividing m_pad within the VMEM budget."""
    budget = max(32, (max_bytes // (4 * k_pad)) // 32 * 32)
    t = min(m_pad, 2048, budget)
    t -= t % 32
    t = max(t, 32)
    while m_pad % t != 0:
        t -= 32
    return t


# ---------------------------------------------------------------------------
# Kernel A: RMSNorm (not materialized) + per-block absmax of |y|
# ---------------------------------------------------------------------------
def _make_rms_absmax_kernel(k_orig, apply_rms):
    inv_k = 1.0 / float(k_orig)   # mean over the *original* K (padding is zeros)

    def kernel(x_ref, g_ref, pmax_ref):
        x = x_ref[...].astype(jnp.float32)                        # (tr, Kp)
        if apply_rms:
            ms = jnp.sum(x * x, axis=-1, keepdims=True) * inv_k   # (tr, 1)
            y = x * jax.lax.rsqrt(ms + EPS_RMS) * g_ref[...]
        else:
            y = x
        row_max = jnp.max(jnp.abs(y), axis=-1, keepdims=True)     # (tr, 1)
        blk_max = jnp.max(row_max, axis=0, keepdims=True)         # (1, 1)
        pmax_ref[...] = jnp.broadcast_to(blk_max, (8, 128))

    return kernel


def rms_absmax(x_p, gamma2d, k_orig, apply_rms, tr, vmem_limit):
    m_pad, k_pad = x_p.shape
    gm = m_pad // tr
    return pl.pallas_call(
        _make_rms_absmax_kernel(k_orig, apply_rms),
        out_shape=jax.ShapeDtypeStruct((gm * 8, 128), jnp.float32),
        grid_spec=pltpu.PrefetchScalarGridSpec(
            num_scalar_prefetch=0,
            grid=(gm,),
            in_specs=[pl.BlockSpec((tr, k_pad), lambda i: (i, 0)),
                      pl.BlockSpec((1, k_pad), lambda i: (0, 0))],
            out_specs=pl.BlockSpec((8, 128), lambda i: (i, 0)),
        ),
        compiler_params=pltpu.CompilerParams(
            dimension_semantics=("parallel",),
            vmem_limit_bytes=vmem_limit),
    )(x_p, gamma2d)


# ---------------------------------------------------------------------------
# Kernel B: fused RMSNorm recompute + activation quantization
# ---------------------------------------------------------------------------
def _make_rms_quant_kernel(k_orig, apply_rms, out_dtype):
    inv_k = 1.0 / float(k_orig)

    def kernel(scale_ref, x_ref, g_ref, aq_ref):
        s = scale_ref[0]
        x = x_ref[...].astype(jnp.float32)
        if apply_rms:
            ms = jnp.sum(x * x, axis=-1, keepdims=True) * inv_k
            y = x * jax.lax.rsqrt(ms + EPS_RMS) * g_ref[...]
        else:
            y = x
        q = jnp.clip(jnp.round(y * s), -128.0, 127.0)
        aq_ref[...] = q.astype(out_dtype)

    return kernel


def rms_quantize_activations(x_p, gamma2d, a_scale, k_orig, apply_rms,
                             out_dtype, tr, vmem_limit):
    m_pad, k_pad = x_p.shape
    gm = m_pad // tr
    s = jnp.reshape(a_scale, (1,)).astype(jnp.float32)
    return pl.pallas_call(
        _make_rms_quant_kernel(k_orig, apply_rms, out_dtype),
        out_shape=jax.ShapeDtypeStruct((m_pad, k_pad), out_dtype),
        grid_spec=pltpu.PrefetchScalarGridSpec(
            num_scalar_prefetch=1,
            grid=(gm,),
            in_specs=[pl.BlockSpec((tr, k_pad), lambda i, sref: (i, 0)),
                      pl.BlockSpec((1, k_pad), lambda i, sref: (0, 0))],
            out_specs=pl.BlockSpec((tr, k_pad), lambda i, sref: (i, 0)),
        ),
        compiler_params=pltpu.CompilerParams(
            dimension_semantics=("parallel",),
            vmem_limit_bytes=vmem_limit),
    )(s, x_p, gamma2d)


# ---------------------------------------------------------------------------
# Kernel C: one-shot ternary weight quantization (f32 -> int8 {-1,0,1})
# ---------------------------------------------------------------------------
def _quant_weight_kernel(scale_ref, w_ref, wq_ref):
    s = scale_ref[0]
    q = jnp.clip(jnp.round(w_ref[...] * s), -1.0, 1.0)
    wq_ref[...] = q.astype(jnp.int8)


def quantize_weights(w_p, b_scale, tk, tn, vmem_limit):
    k_pad, n_pad = w_p.shape
    s = jnp.reshape(b_scale, (1,)).astype(jnp.float32)
    return pl.pallas_call(
        _quant_weight_kernel,
        out_shape=jax.ShapeDtypeStruct((k_pad, n_pad), jnp.int8),
        grid_spec=pltpu.PrefetchScalarGridSpec(
            num_scalar_prefetch=1,
            grid=(k_pad // tk, n_pad // tn),
            in_specs=[pl.BlockSpec((tk, tn), lambda i, j, sref: (i, j))],
            out_specs=pl.BlockSpec((tk, tn), lambda i, j, sref: (i, j)),
        ),
        compiler_params=pltpu.CompilerParams(
            dimension_semantics=("parallel", "parallel"),
            vmem_limit_bytes=vmem_limit),
    )(s, w_p)


# ---------------------------------------------------------------------------
# Kernel D: tiled MXU matmul on pre-quantized operands + fused dequant
# ---------------------------------------------------------------------------
def _make_matmul_kernel(int8_path):
    if int8_path:
        def kernel(inv_ref, a_ref, b_ref, o_ref, acc_ref):
            @pl.when(pl.program_id(2) == 0)
            def _():
                acc_ref[...] = jnp.zeros_like(acc_ref)

            acc_ref[...] += jnp.dot(a_ref[...], b_ref[...],
                                    preferred_element_type=jnp.int32)

            @pl.when(pl.program_id(2) == pl.num_programs(2) - 1)
            def _():
                # inv_ref[0] is 1/(A_scale*B_scale), or exactly 0.0 when the
                # |dequant_factor| < 1e-9 guard triggers (zero output).
                o_ref[...] = acc_ref[...].astype(jnp.float32) * inv_ref[0]
    else:
        def kernel(inv_ref, a_ref, b_ref, o_ref, acc_ref):
            @pl.when(pl.program_id(2) == 0)
            def _():
                acc_ref[...] = jnp.zeros_like(acc_ref)

            acc_ref[...] += jnp.dot(a_ref[...], b_ref[...].astype(jnp.bfloat16),
                                    preferred_element_type=jnp.float32)

            @pl.when(pl.program_id(2) == pl.num_programs(2) - 1)
            def _():
                o_ref[...] = acc_ref[...] * inv_ref[0]

    return kernel


def bit_matmul(a_q, b_q, inv_df, tm, tn, tk, int8_path, vmem_limit):
    m_pad, k_pad = a_q.shape
    _, n_pad = b_q.shape
    inv = jnp.reshape(inv_df, (1,)).astype(jnp.float32)
    acc_dtype = jnp.int32 if int8_path else jnp.float32
    return pl.pallas_call(
        _make_matmul_kernel(int8_path),
        out_shape=jax.ShapeDtypeStruct((m_pad, n_pad), jnp.float32),
        grid_spec=pltpu.PrefetchScalarGridSpec(
            num_scalar_prefetch=1,
            grid=(m_pad // tm, n_pad // tn, k_pad // tk),
            in_specs=[pl.BlockSpec((tm, tk), lambda i, j, k, sref: (i, k)),
                      pl.BlockSpec((tk, tn), lambda i, j, k, sref: (k, j))],
            out_specs=pl.BlockSpec((tm, tn), lambda i, j, k, sref: (i, j)),
            scratch_shapes=[pltpu.VMEM((tm, tn), acc_dtype)],
        ),
        compiler_params=pltpu.CompilerParams(
            dimension_semantics=("parallel", "parallel", "arbitrary"),
            vmem_limit_bytes=vmem_limit),
    )(inv, a_q, b_q)


# ---------------------------------------------------------------------------
# BitLinear.forward
# ---------------------------------------------------------------------------
def bit_linear_forward(x, weight, rms_gamma=None, use_rms_norm=True):
    in_features, out_features = weight.shape
    orig_shape = x.shape
    x2d = x.reshape(-1, in_features).astype(jnp.float32)
    M, K = x2d.shape
    N = out_features

    is_v7 = _is_v7()
    int8_path = _mxu_supports_int8()
    vmem_limit = _vmem_limit_bytes()

    tm_cap = 512
    tn_cap = 512 if is_v7 else 1024
    tk_cap = 2048

    # hardware-granularity padding + waste-bounded tile selection
    tm, m_pad = _choose_tile(M, tm_cap, 32)
    tn, n_pad = _choose_tile(N, tn_cap, 128)
    tk, k_pad = _choose_tile(K, tk_cap, 128)

    if (m_pad, k_pad) != (M, K):
        x_p = jnp.pad(x2d, ((0, m_pad - M), (0, k_pad - K)))
    else:
        x_p = x2d

    w_f32 = weight.astype(jnp.float32)
    if (k_pad, n_pad) != (K, N):
        w_p = jnp.pad(w_f32, ((0, k_pad - K), (0, n_pad - N)))
    else:
        w_p = w_f32

    if use_rms_norm and rms_gamma is not None:
        gamma = rms_gamma.astype(jnp.float32)
    else:
        gamma = jnp.ones((K,), jnp.float32)
    g2d = jnp.pad(gamma, (0, k_pad - K)).reshape(1, k_pad)

    tr = _pick_rows(m_pad, k_pad)

    # pass 1: global max(|RMSNorm(x)|), normalized activation never hits HBM
    pmax = rms_absmax(x_p, g2d, K, use_rms_norm, tr, vmem_limit)
    a_max = jnp.max(pmax)

    # per-tensor scales (tiny scalar reductions in plain-JAX glue)
    a_scale = 127.0 / jnp.maximum(a_max, EPS_Q)
    # TODO(synk): cache b_scale / b_q for inference (weights are static).
    b_scale = 1.0 / jnp.maximum(jnp.mean(jnp.abs(w_f32)), EPS_Q)

    act_dtype = jnp.int8 if int8_path else jnp.bfloat16
    a_q = rms_quantize_activations(x_p, g2d, a_scale, K, use_rms_norm,
                                   act_dtype, tr, vmem_limit)
    b_q = quantize_weights(w_p, b_scale, tk, tn, vmem_limit)

    df = a_scale * b_scale
    inv_df = jnp.where(jnp.abs(df) < DEQUANT_EPS, 0.0, 1.0 / df)

    out = bit_matmul(a_q, b_q, inv_df, tm, tn, tk, int8_path, vmem_limit)
    out = out[:M, :N]
    return out.reshape(*orig_shape[:-1], out_features)


# ---------------------------------------------------------------------------
# pure-JAX reference (same math, no Pallas)
# ---------------------------------------------------------------------------
def bit_linear_reference(x, weight, rms_gamma, use_rms_norm=True):
    in_features, out_features = weight.shape
    x2 = x.reshape(-1, in_features).astype(jnp.float32)
    if use_rms_norm:
        ms = jnp.mean(x2 * x2, axis=-1, keepdims=True)
        x2 = x2 * jax.lax.rsqrt(ms + EPS_RMS) * rms_gamma
    a_scale = 127.0 / jnp.maximum(jnp.max(jnp.abs(x2)), EPS_Q)
    b_scale = 1.0 / jnp.maximum(jnp.mean(jnp.abs(weight)), EPS_Q)
    a_q = jnp.clip(jnp.round(x2 * a_scale), -128.0, 127.0)
    b_t = jnp.clip(jnp.round(weight * b_scale), -1.0, 1.0)
    df = a_scale * b_scale
    acc = jnp.dot(a_q, b_t, precision=jax.lax.Precision.HIGHEST)
    out = jnp.where(jnp.abs(df) < DEQUANT_EPS, 0.0, acc / df)
    return out.reshape(*x.shape[:-1], out_features)


# ---------------------------------------------------------------------------
def _run_case(seed, batch, seq, in_features, out_features, rtol, atol):
    key = jax.random.PRNGKey(seed)
    kx, kw = jax.random.split(key)
    # kaiming_uniform_(a=sqrt(5)) on a (in_features, out_features) tensor:
    # U(-1/sqrt(fan_in), 1/sqrt(fan_in)) with fan_in = out_features
    bound = 1.0 / math.sqrt(out_features)
    weight = jax.random.uniform(kw, (in_features, out_features),
                                dtype=jnp.float32, minval=-bound, maxval=bound)
    rms_gamma = jnp.ones((in_features,), dtype=jnp.float32)  # RMSNorm weight init
    x = jax.random.normal(kx, (batch, seq, in_features), dtype=jnp.float32)

    out = bit_linear_forward(x, weight, rms_gamma, use_rms_norm=True)
    out = jax.block_until_ready(out)
    ref = bit_linear_reference(x, weight, rms_gamma, use_rms_norm=True)

    assert out.shape == (batch, seq, out_features), out.shape
    # Tolerance allows for rare +/-1 LSB activation-quantization boundary flips
    # (|effect| ~ 1/(A_scale*B_scale)) caused by differing f32 reduction order
    # between Mosaic and XLA; structural errors would be orders of magnitude larger.
    err = jnp.max(jnp.abs(out - ref))
    assert jnp.allclose(out, ref, rtol=rtol, atol=atol), f"max abs err {err}"


if __name__ == "__main__":
    # small shape consistent with the module (batch=2, seq=8, hidden=32)
    _run_case(0, batch=2, seq=8, in_features=32, out_features=32,
              rtol=2e-3, atol=5e-3)
    # non-aligned shape: exercises M tiling + hardware-granularity padding
    # (M 800->832, K 1300->1408, N 320->384) with a single K block
    _run_case(1, batch=4, seq=200, in_features=1300, out_features=320,
              rtol=5e-3, atol=1e-2)
    # large-K shape: exercises the K-tiled accumulator path (3 K steps, no padding)
    _run_case(2, batch=2, seq=96, in_features=4608, out_features=384,
              rtol=5e-3, atol=1e-2)
    print("KERNEL_OK")
</pallas_src>

<mosaic_0001>
module attributes {stable_mosaic.version = 11 : i64} {
  func.func @kernel(%arg0: i32, %arg1: memref<32x128xf32, #tpu.memory_space<vmem>>, %arg2: memref<1x128xf32, #tpu.memory_space<vmem>>, %arg3: memref<8x128xf32, #tpu.memory_space<vmem>>) attributes {dimension_semantics = [#tpu.dimension_semantics<parallel>], iteration_bounds = array<i64: 1>, scalar_prefetch = 0 : i64, scratch_operands = 0 : i64, tpu.core_type = #tpu.core_type<tc>, window_params = [{transform_indices = @transform_0, window_bounds = array<i64: 32, 128>}, {pipeline_mode = #tpu.pipeline_mode<synchronous>, transform_indices = @transform_1, window_bounds = array<i64: 1, 128>}, {transform_indices = @transform_2, window_bounds = array<i64: 8, 128>}]} {
    %c0 = arith.constant 0 : index
    %c0_0 = arith.constant 0 : index
    %0 = vector.load %arg1[%c0, %c0_0] : memref<32x128xf32, #tpu.memory_space<vmem>>, vector<32x128xf32>
    %1 = arith.mulf %0, %0 : vector<32x128xf32>
    %cst = arith.constant dense<0.000000e+00> : vector<32xf32>
    %2 = vector.multi_reduction <add>, %1, %cst [1] : vector<32x128xf32> to vector<32xf32>
    %3 = vector.shape_cast %2 : vector<32xf32> to vector<32x1xf32>
    %cst_1 = arith.constant 3.125000e-02 : f32
    %4 = vector.broadcast %cst_1 : f32 to vector<32x1xf32>
    %5 = arith.mulf %3, %4 : vector<32x1xf32>
    %cst_2 = arith.constant 9.99999997E-7 : f32
    %6 = vector.broadcast %cst_2 : f32 to vector<32x1xf32>
    %7 = arith.addf %5, %6 : vector<32x1xf32>
    %8 = math.rsqrt %7 : vector<32x1xf32>
    %9 = vector.broadcast %8 : vector<32x1xf32> to vector<32x128xf32>
    %10 = arith.mulf %0, %9 : vector<32x128xf32>
    %c0_3 = arith.constant 0 : index
    %c0_4 = arith.constant 0 : index
    %11 = vector.load %arg2[%c0_3, %c0_4] : memref<1x128xf32, #tpu.memory_space<vmem>>, vector<1x128xf32>
    %12 = vector.broadcast %11 : vector<1x128xf32> to vector<32x128xf32>
    %13 = arith.mulf %10, %12 : vector<32x128xf32>
    %14 = math.absf %13 : vector<32x128xf32>
    %cst_5 = arith.constant dense<0xFF800000> : vector<32xf32>
    %15 = vector.multi_reduction <maximumf>, %14, %cst_5 [1] : vector<32x128xf32> to vector<32xf32>
    %16 = vector.shape_cast %15 : vector<32xf32> to vector<32x1xf32>
    %cst_6 = arith.constant dense<0xFF800000> : vector<1xf32>
    %17 = vector.multi_reduction <maximumf>, %16, %cst_6 [0] : vector<32x1xf32> to vector<1xf32>
    %18 = vector.shape_cast %17 : vector<1xf32> to vector<1x1xf32>
    %19 = vector.shape_cast %18 : vector<1x1xf32> to vector<1x1xf32>
    %20 = vector.broadcast %19 : vector<1x1xf32> to vector<8x128xf32>
    %c0_7 = arith.constant 0 : index
    %c0_8 = arith.constant 0 : index
    %21 = vector.load %arg3[%c0_7, %c0_8] : memref<8x128xf32, #tpu.memory_space<vmem>>, vector<8x128xf32>
    tpu.vector_store %arg3[%c0_7, %c0_8], %20 {strides = array<i32>} : memref<8x128xf32, #tpu.memory_space<vmem>>, vector<8x128xf32>,
    return
  }
  func.func @transform_0(%arg0: i32) -> (i32, i32) {
    %c0_i32 = arith.constant 0 : i32
    %c0_i32_0 = arith.constant 0 : i32
    return %arg0, %c0_i32 : i32, i32
  }
  func.func @transform_1(%arg0: i32) -> (i32, i32) {
    %c0_i32 = arith.constant 0 : i32
    %c0_i32_0 = arith.constant 0 : i32
    %c0_i32_1 = arith.constant 0 : i32
    return %c0_i32, %c0_i32_0 : i32, i32
  }
  func.func @transform_2(%arg0: i32) -> (i32, i32) {
    %c0_i32 = arith.constant 0 : i32
    %c0_i32_0 = arith.constant 0 : i32
    return %arg0, %c0_i32 : i32, i32
  }
}

</mosaic_0001>

<bundles_post_ra>
// kernel: tpu_custom_call.1
= control target key start
LH: loop header
LB: loop body
LE: loop exit
PB: predicated region body
PF: predicated region fallthrough
CT: control target
= control target key end

     0   :  { %7 = vsyncpa [#allocation3], 0  ;;  %s261_s0 = inlined_call_operand.hbm [shape: f32[32,128], index: 0, kind: input, shape index: {}]   ;;  %s262_s1 = inlined_call_operand.hbm [shape: f32[1,128], index: 1, kind: input, shape index: {}]   ;;  %s263_s2 = inlined_call_operand.hbm [shape: f32[8,128], index: 2, kind: output, shape index: {}]  }
   0x1   :  { %8 = vsyncpa [#allocation6], 0 }
   0x2   :  { %9 = vsyncpa [#allocation4], 0  ;;  %s205_s9 = smov [#allocation2]   ;;  %s133_s13 = scalar_lea.hbm %s261_s0, 512 }
   0x3   :  { %s15_s10 = sshll.u32 %s205_s9, 4  ;;  %p134_p0 = scmp.ne.s32.totalorder %s261_s0, %s133_s13  ;;  %s16_s10 = int_to_ptr.vmem [resolvable:$true] %s15_s10 }
   0x4   :  { %p137_p1 = scmp.lt.u32.totalorder %s133_s13, %s261_s0 }
   0x6   :  { %p139_p2 = pnand %p137_p1, %p134_p0 }
   0x8   :  { %142 = shalt.err (!%p139_p2)
}
   0x9   :  { %s143_s18 = scalar_lea.vmem %s16_s10, 512  ;;  %p148_p4 = scmp.lt.s32.totalorder %s16_s10, %s16_s10 }
   0xa   :  { %p144_p3 = scmp.ne.s32.totalorder %s16_s10, %s143_s18  ;;  %p149_p5 = scmp.lt.s32.totalorder %s143_s18, %s143_s18 }
   0xc   :  { %p150_p6 = por %p149_p5, %p148_p4 }
   0xe   :  { %p151_p7 = pnand %p150_p6, %p144_p3 }
  0x10   :  { %154 = shalt.err (!%p151_p7)
}
  0x11   :  { %s206_s19 = smov 128   ;;  %s207_s20 = smov 8  }
  0x12   :  { %21 = dma.hbm_to_vmem [thread:$0]  %s261_s0, 512, %s16_s10, [#allocation3], %s206_s19, %s206_s19, %s207_s20  }
  0x13   :  { %s208_s23 = smov [#allocation5]   ;;  %s155_s27 = scalar_lea.hbm %s262_s1, 16 }
  0x14   :  { %s28_s24 = sshll.u32 %s208_s23, 4  ;;  %p156_p8 = scmp.ne.s32.totalorder %s262_s1, %s155_s27  ;;  %s29_s24 = int_to_ptr.vmem [resolvable:$true] %s28_s24 }
  0x15   :  { %p159_p9 = scmp.lt.u32.totalorder %s155_s27, %s262_s1 }
  0x17   :  { %p161_p10 = pnand %p159_p9, %p156_p8 }
  0x19   :  { %164 = shalt.err (!%p161_p10)
}
  0x1a   :  { %s165_s4 = scalar_lea.vmem %s29_s24, 16  ;;  %s169_s0 = scalar_lea.vmem %s29_s24, 32 }
  0x1b   :  { %p166_p11 = scmp.ne.s32.totalorder %s29_s24, %s165_s4  ;;  %p170_p12 = scmp.lt.s32.totalorder %s29_s24, %s29_s24 }
  0x1c   :  { %p171_p13 = scmp.lt.s32.totalorder %s169_s0, %s165_s4 }
  0x1e   :  { %p172_p0 = por %p171_p13, %p170_p12 }
  0x20   :  { %p173_p1 = pnand %p172_p0, %p166_p11 }
  0x22   :  { %176 = shalt.err (!%p173_p1)
}
  0x23   :  { %31 = dma.hbm_to_vmem [thread:$0]  %s262_s1, 16, %s29_s24, [#allocation6]  }
  0x24   :  { %199 = dma.done.wait [#allocation3], 512  }
  0x25   :  { %200 = vsyncadd [#allocation3], 4294966784 }
  0x26   :  { %201 = dma.done.wait [#allocation6], 16  }
  0x27   :  { %202 = vsyncadd [#allocation6], 4294967280  ;;  %v38_v0 = vld [vmem:[#allocation2] sm:$0xff]  ;;  %v40_v1 = vld [vmem:[#allocation2 + $0x10] sm:$0xff]  ;;  %s209_s1 = smov [#allocation7]  }
  0x28   :  { %v39_v2 = vld [vmem:[#allocation2 + $0x8] sm:$0xff]  ;;  %v42_v3 = vmul.f32 %v38_v0, %v38_v0  ;;  %v44_v4 = vmul.f32 %v40_v1, %v40_v1  ;;  %v41_v5 = vld [vmem:[#allocation2 + $0x18] sm:$0xff]  ;;  %v119_v21 = vld [vmem:[#allocation5] ss:$0 sm:$0xff]  ;;  %s109_s7 = sshll.u32 %s209_s1, 4  ;;  %s110_s7 = int_to_ptr.vmem [resolvable:$true] %s109_s7 }
  0x29   :  { %v43_v6 = vmul.f32 %v39_v2, %v39_v2  ;;  %v45_v7 = vmul.f32 %v41_v5, %v41_v5  ;;  %s177_s8 = scalar_lea.vmem %s110_s7, 128  ;;  %p182_p3 = scmp.lt.s32.totalorder %s110_s7, %s110_s7 }
  0x2a   :  { %46 = vadd.xlane.f32.xlu0 %v42_v3  ;;  %50 = vadd.xlane.f32.xlu1 %v44_v4  ;;  %p178_p2 = scmp.ne.s32.totalorder %s110_s7, %s177_s8  ;;  %p183_p4 = scmp.lt.s32.totalorder %s177_s8, %s177_s8 }
  0x2c   :  { %p184_p5 = por %p183_p4, %p182_p3 }
  0x2e   :  { %48 = vadd.xlane.f32.xlu0 %v43_v6  ;;  %52 = vadd.xlane.f32.xlu1 %v45_v7  ;;  %p185_p6 = pnand %p184_p5, %p178_p2 }
  0xb7   :  { %v47_v8 = vpop.xlane.xlu0 %46  ;;  %v51_v9 = vpop.xlane.xlu1 %50 }
  0xb8   :  { %v54_v10 = vmul.f32 0.03125, %v47_v8  ;;  %v56_v11 = vmul.f32 0.03125, %v51_v9 }
  0xba   :  { %v58_v12 = vadd.f32 1e-06, %v54_v10  ;;  %v60_v13 = vadd.f32 1e-06, %v56_v11 }
  0xbb   :  { %v49_v14 = vpop.xlane.xlu0 %48  ;;  %v53_v15 = vpop.xlane.xlu1 %52 }
  0xbc   :  { %125 = vrsqrt.f32 %v58_v12  ;;  %v55_v16 = vmul.f32 0.03125, %v49_v14  ;;  %v57_v17 = vmul.f32 0.03125, %v53_v15 }
  0xbd   :  { %127 = vrsqrt.f32 %v60_v13 }
  0xbe   :  { %v59_v18 = vadd.f32 1e-06, %v55_v16  ;;  %v61_v19 = vadd.f32 1e-06, %v57_v17 }
  0xc0   :  { %129 = vrsqrt.f32 %v59_v18 }
  0xc1   :  { %131 = vrsqrt.f32 %v61_v19 }
  0xc6   :  { %v126_v20 = vpop.eup %125 }
  0xc7   :  { %v128_v22 = vpop.eup %127  ;;  %v66_v23 = vmul.f32 %v126_v20, %v38_v0 }
  0xc8   :  { %v68_v24 = vmul.f32 %v128_v22, %v40_v1 }
  0xc9   :  { %v77_v25 = vmul.f32 %v119_v21, %v66_v23 }
  0xca   :  { %v130_v26 = vpop.eup %129  ;;  %v79_v27 = vmul.f32 %v119_v21, %v68_v24 }
  0xcb   :  { %v132_v28 = vpop.eup %131  ;;  %v81_v29 = vand.u32 2147483647, %v77_v25  ;;  %v67_v30 = vmul.f32 %v130_v26, %v39_v2 }
  0xcc   :  { %v69_v31 = vmul.f32 %v132_v28, %v41_v5  ;;  %v83_v32 = vand.u32 2147483647, %v79_v27 }
  0xcd   :  { %85 = vmax.xlane.f32.xlu0 %v81_v29  ;;  %v78_v33 = vmul.f32 %v119_v21, %v67_v30 }
  0xce   :  { %v80_v34 = vmul.f32 %v119_v21, %v69_v31 }
  0xcf   :  { %v82_v35 = vand.u32 2147483647, %v78_v33 }
  0xd0   :  { %v84_v36 = vand.u32 2147483647, %v80_v34 }
  0xd1   :  { %89 = vmax.xlane.f32.xlu0 %v83_v32  ;;  %87 = vmax.xlane.f32.xlu1 %v82_v35 }
  0xd5   :  { %91 = vmax.xlane.f32.xlu1 %v84_v36 }
 0x15a   :  { %v86_v37 = vpop.xlane.xlu0 %85 }
 0x15e   :  { %v88_v38 = vpop.xlane.xlu1 %87  ;;  %v90_v39 = vpop.xlane.xlu0 %89 }
 0x15f   :  { %v93_v41 = vmax.f32 %v86_v37, %v88_v38 }
 0x162   :  { %v92_v40 = vpop.xlane.xlu1 %91 }
 0x163   :  { %v94_v42 = vmax.f32 %v90_v39, %v92_v40 }
 0x165   :  { %v95_v43 = vmax.f32 %v93_v41, %v94_v42 }
 0x167   :  { %v96_v44 = vrot.slane %v95_v43, 4 }
 0x169   :  { %v97_v45 = vmax.f32 %v95_v43, %v96_v44 }
 0x16b   :  { %v98_v46 = vrot.slane %v97_v45, 2 }
 0x16d   :  { %v99_v47 = vmax.f32 %v97_v45, %v98_v46 }
 0x16f   :  { %v100_v48 = vrot.slane %v99_v47, 1 }
 0x171   :  { %v101_v49 = vmax.f32 %v99_v47, %v100_v48 }
 0x173   :  { %102 = vst [vmem:[#allocation7] sm:$0xff] %v101_v49 }
 0x174   :  { %188 = shalt.err (!%p185_p6)
}
 0x175   :  { %s189_s11 = scalar_lea.hbm %s263_s2, 128 }
 0x176   :  { %p190_p7 = scmp.ne.s32.totalorder %s263_s2, %s189_s11  ;;  %p193_p8 = scmp.lt.u32.totalorder %s189_s11, %s263_s2 }
 0x178   :  { %p195_p9 = pnand %p193_p8, %p190_p7 }
 0x17a   :  { %198 = shalt.err (!%p195_p9)
}
 0x17b   :  { %112 = dma.vmem_to_hbm [thread:$0]  %s110_s7, 128, %s263_s2, [#allocation4]  }
 0x17c   :  { %203 = dma.done.wait [#allocation4], 128  }
 0x17d   :  { %204 = vsyncadd [#allocation4], 4294967168 }
 0x17e   :  { %116 = vsyncpa [#allocation3], 1 }
 0x17f   :  { %117 = vsyncpa [#allocation6], 1 }
 0x180   :  { %118 = vsyncpa [#allocation4], 1 }

</bundles_post_ra>
